<compile_context>
chip_gen: v5e
topology: v5e:2x2
jax: 0.10.0
libtpu: 0.0.40
codegen_flags: <defaults>
</compile_context>

<pallas_src>
import functools

import jax
import jax.numpy as jnp
from jax.experimental import pallas as pl
from jax.experimental.pallas import tpu as pltpu

HIDDEN = 128
MAX_BATCH_TILE = 512  # tiny tiles (<~0.5 MiB each) -> keep grid steps few


def gru_fc_kernel(x_ref, wih_ref, bfold_ref, bhhn_ref, wfc_ref, bfc_ref,
                  out_ref):
    H = HIDDEN
    x = x_ref[...].astype(jnp.float32)                          # (TB, D)

    # Input-side gates: x @ W_ih^T + folded bias -> (TB, 3H)
    gi = (jnp.dot(x, wih_ref[...], preferred_element_type=jnp.float32)
          + bfold_ref[...])

    # PyTorch GRU gate order: r, z, n.  h0 == 0, so gh == b_hh exactly
    # (r/z parts already folded into bfold; only b_hh_n enters via r * b_hh_n).
    r = jax.nn.sigmoid(gi[:, 0 * H:1 * H])
    z = jax.nn.sigmoid(gi[:, 1 * H:2 * H])
    n = jnp.tanh(gi[:, 2 * H:3 * H] + r * bhhn_ref[...])
    h = (1.0 - z) * n                                           # (TB, H)

    # Final Linear: h @ W_fc^T + b_fc  (classes padded to full lane width)
    out_ref[...] = (jnp.dot(h, wfc_ref[...], preferred_element_type=jnp.float32)
                    + bfc_ref[...])


@functools.partial(jax.jit, static_argnames=("num_classes",))
def gru_network_forward(x, params, num_classes):
    B, D = x.shape
    H = HIDDEN
    C_pad = params["w_fc_t"].shape[1]

    # Batch tiling: single full-batch tile for small B; MAX_BATCH_TILE-row
    # tiles otherwise (feeds the 256-wide MXU, keeps per-step overhead low,
    # and lets the "parallel" grid axis shard across v7x's two TensorCores).
    # Weights use constant index_maps so they stay VMEM-resident across steps.
    if B <= MAX_BATCH_TILE:
        TB, B_pad = B, B
        x_p = x
    else:
        TB = MAX_BATCH_TILE
        B_pad = pl.cdiv(B, TB) * TB
        x_p = jnp.pad(x, ((0, B_pad - B), (0, 0)))

    flops = 2 * B_pad * D * 3 * H + 2 * B_pad * H * C_pad
    transcendentals = B_pad * 3 * H
    bytes_accessed = 4 * (B_pad * D + D * 3 * H + 3 * H + H
                          + H * C_pad + C_pad + B_pad * C_pad)

    out_padded = pl.pallas_call(
        gru_fc_kernel,
        out_shape=jax.ShapeDtypeStruct((B_pad, C_pad), jnp.float32),
        grid_spec=pltpu.PrefetchScalarGridSpec(
            num_scalar_prefetch=0,
            grid=(B_pad // TB,),
            in_specs=[
                pl.BlockSpec((TB, D), lambda i: (i, 0)),        # x
                pl.BlockSpec((D, 3 * H), lambda i: (0, 0)),     # W_ih^T
                pl.BlockSpec((1, 3 * H), lambda i: (0, 0)),     # b_fold
                pl.BlockSpec((1, H), lambda i: (0, 0)),         # b_hh_n
                pl.BlockSpec((H, C_pad), lambda i: (0, 0)),     # W_fc^T
                pl.BlockSpec((1, C_pad), lambda i: (0, 0)),     # b_fc
            ],
            out_specs=pl.BlockSpec((TB, C_pad), lambda i: (i, 0)),
        ),
        compiler_params=pltpu.CompilerParams(
            dimension_semantics=("parallel",)),
        cost_estimate=pl.CostEstimate(
            flops=flops,
            transcendentals=transcendentals,
            bytes_accessed=bytes_accessed),
    )(x_p, params["w_ih_t"], params["b_fold"], params["b_hh_n"],
      params["w_fc_t"], params["b_fc"])

    return out_padded[:B, :num_classes]


def init_params(key, input_size, num_classes):
    """Deterministic init mirroring PyTorch shapes (uniform +-1/sqrt(H))."""
    H = HIDDEN
    C_pad = 128  # keep the class dim lane-dense (one full lane group)
    k = 1.0 / jnp.sqrt(jnp.float32(H))
    keys = jax.random.split(key, 6)

    w_ih = jax.random.uniform(keys[0], (3 * H, input_size), jnp.float32, -k, k)
    w_hh = jax.random.uniform(keys[1], (3 * H, H), jnp.float32, -k, k)
    b_ih = jax.random.uniform(keys[2], (3 * H,), jnp.float32, -k, k)
    b_hh = jax.random.uniform(keys[3], (3 * H,), jnp.float32, -k, k)
    w_fc = jax.random.uniform(keys[4], (num_classes, H), jnp.float32, -k, k)
    b_fc = jax.random.uniform(keys[5], (num_classes,), jnp.float32, -k, k)

    # Fold b_hh into b_ih for the r and z gates (exact since h0 == 0); the n
    # gate keeps b_hh_n separate because it enters as r * b_hh_n.
    b_fold = jnp.concatenate(
        [b_ih[:2 * H] + b_hh[:2 * H], b_ih[2 * H:]]).reshape(1, 3 * H)
    b_hh_n = b_hh[2 * H:].reshape(1, H)

    w_fc_t = jnp.zeros((H, C_pad), jnp.float32).at[:, :num_classes].set(w_fc.T)
    b_fc_p = jnp.zeros((1, C_pad), jnp.float32).at[0, :num_classes].set(b_fc)

    # NOTE(v5e): for bandwidth-starved v5e, w_ih_t / w_fc_t could be stored as
    # bfloat16 (dots keep preferred_element_type=f32); kept f32 here so the
    # kernel matches the f32 reference to tight tolerance.
    return {
        "w_ih_t": w_ih.T,                 # (D, 3H)
        "b_fold": b_fold,                 # (1, 3H)
        "b_hh_n": b_hh_n,                 # (1, H)
        "w_fc_t": w_fc_t,                 # (H, C_pad)
        "b_fc": b_fc_p,                   # (1, C_pad)
        # raw params kept for the pure-JAX reference check
        "w_ih": w_ih, "w_hh": w_hh, "b_ih_raw": b_ih, "b_hh_raw": b_hh,
        "w_fc": w_fc, "b_fc_raw": b_fc,
    }


def reference_forward(x, p, num_classes):
    """Pure-JAX reference of the full PyTorch forward (seq_len=1, h0=0)."""
    H = HIDDEN
    gi = x @ p["w_ih"].T + p["b_ih_raw"]
    h0 = jnp.zeros((x.shape[0], H), jnp.float32)
    gh = h0 @ p["w_hh"].T + p["b_hh_raw"]
    r = jax.nn.sigmoid(gi[:, :H] + gh[:, :H])
    z = jax.nn.sigmoid(gi[:, H:2 * H] + gh[:, H:2 * H])
    n = jnp.tanh(gi[:, 2 * H:] + r * gh[:, 2 * H:])
    h = (1.0 - z) * n + z * h0
    return h @ p["w_fc"].T + p["b_fc_raw"]


if __name__ == "__main__":
    key = jax.random.PRNGKey(0)
    B, INPUT_SIZE, NUM_CLASSES = 8, 64, 6   # CREMA-D has 6 emotion classes

    k_x, k_p = jax.random.split(key)
    x = jax.random.normal(k_x, (B, INPUT_SIZE), jnp.float32)
    params = init_params(k_p, INPUT_SIZE, NUM_CLASSES)

    out = gru_network_forward(x, params, NUM_CLASSES)
    out = jax.block_until_ready(out)

    ref = reference_forward(x, params, NUM_CLASSES)
    assert out.shape == (B, NUM_CLASSES)
    assert jnp.allclose(out, ref, atol=1e-5, rtol=1e-5), "mismatch vs reference"

    print("KERNEL_OK")
</pallas_src>

<mosaic_0001>
module attributes {stable_mosaic.version = 11 : i64} {
  func.func @gru_fc_kernel(%arg0: i32, %arg1: memref<8x64xf32, #tpu.memory_space<vmem>>, %arg2: memref<64x384xf32, #tpu.memory_space<vmem>>, %arg3: memref<1x384xf32, #tpu.memory_space<vmem>>, %arg4: memref<1x128xf32, #tpu.memory_space<vmem>>, %arg5: memref<128x128xf32, #tpu.memory_space<vmem>>, %arg6: memref<1x128xf32, #tpu.memory_space<vmem>>, %arg7: memref<8x128xf32, #tpu.memory_space<vmem>>) attributes {dimension_semantics = [#tpu.dimension_semantics<parallel>], iteration_bounds = array<i64: 1>, scalar_prefetch = 0 : i64, scratch_operands = 0 : i64, tpu.core_type = #tpu.core_type<tc>, window_params = [{transform_indices = @transform_0, window_bounds = array<i64: 8, 64>}, {pipeline_mode = #tpu.pipeline_mode<synchronous>, transform_indices = @transform_1, window_bounds = array<i64: 64, 384>}, {pipeline_mode = #tpu.pipeline_mode<synchronous>, transform_indices = @transform_2, window_bounds = array<i64: 1, 384>}, {pipeline_mode = #tpu.pipeline_mode<synchronous>, transform_indices = @transform_3, window_bounds = array<i64: 1, 128>}, {pipeline_mode = #tpu.pipeline_mode<synchronous>, transform_indices = @transform_4, window_bounds = array<i64: 128, 128>}, {pipeline_mode = #tpu.pipeline_mode<synchronous>, transform_indices = @transform_5, window_bounds = array<i64: 1, 128>}, {transform_indices = @transform_6, window_bounds = array<i64: 8, 128>}]} {
    %c0 = arith.constant 0 : index
    %c0_0 = arith.constant 0 : index
    %0 = vector.load %arg1[%c0, %c0_0] : memref<8x64xf32, #tpu.memory_space<vmem>>, vector<8x64xf32>
    %c0_1 = arith.constant 0 : index
    %c0_2 = arith.constant 0 : index
    %1 = vector.load %arg2[%c0_1, %c0_2] : memref<64x384xf32, #tpu.memory_space<vmem>>, vector<64x384xf32>
    %cst = arith.constant dense<0.000000e+00> : vector<8x384xf32>
    %2 = tpu.matmul %0, %1, %cst {dimension_numbers = #tpu.dot_dimension_numbers<[1], [0], [0], [1], [0, 0, 1, 1], [], []>} : vector<8x64xf32>, vector<64x384xf32>, vector<8x384xf32> -> vector<8x384xf32>
    %c0_3 = arith.constant 0 : index
    %c0_4 = arith.constant 0 : index
    %3 = vector.load %arg3[%c0_3, %c0_4] : memref<1x384xf32, #tpu.memory_space<vmem>>, vector<1x384xf32>
    %4 = vector.broadcast %3 : vector<1x384xf32> to vector<8x384xf32>
    %5 = arith.addf %2, %4 : vector<8x384xf32>
    %6 = vector.extract_strided_slice %5 {offsets = [0, 0], sizes = [8, 128], strides = [1, 1]} : vector<8x384xf32> to vector<8x128xf32>
    %7 = arith.negf %6 : vector<8x128xf32>
    %8 = math.exp %7 : vector<8x128xf32>
    %cst_5 = arith.constant 1.000000e+00 : f32
    %9 = vector.broadcast %cst_5 : f32 to vector<8x128xf32>
    %10 = arith.addf %9, %8 : vector<8x128xf32>
    %11 = arith.divf %9, %10 : vector<8x128xf32>
    %12 = vector.extract_strided_slice %5 {offsets = [0, 128], sizes = [8, 128], strides = [1, 1]} : vector<8x384xf32> to vector<8x128xf32>
    %13 = arith.negf %12 : vector<8x128xf32>
    %14 = math.exp %13 : vector<8x128xf32>
    %cst_6 = arith.constant 1.000000e+00 : f32
    %15 = vector.broadcast %cst_6 : f32 to vector<8x128xf32>
    %16 = arith.addf %15, %14 : vector<8x128xf32>
    %17 = arith.divf %15, %16 : vector<8x128xf32>
    %18 = vector.extract_strided_slice %5 {offsets = [0, 256], sizes = [8, 128], strides = [1, 1]} : vector<8x384xf32> to vector<8x128xf32>
    %c0_7 = arith.constant 0 : index
    %c0_8 = arith.constant 0 : index
    %19 = vector.load %arg4[%c0_7, %c0_8] : memref<1x128xf32, #tpu.memory_space<vmem>>, vector<1x128xf32>
    %20 = vector.broadcast %19 : vector<1x128xf32> to vector<8x128xf32>
    %21 = arith.mulf %11, %20 : vector<8x128xf32>
    %22 = arith.addf %18, %21 : vector<8x128xf32>
    %23 = math.tanh %22 : vector<8x128xf32>
    %cst_9 = arith.constant 1.000000e+00 : f32
    %24 = vector.broadcast %cst_9 : f32 to vector<8x128xf32>
    %25 = arith.subf %24, %17 : vector<8x128xf32>
    %26 = arith.mulf %25, %23 : vector<8x128xf32>
    %c0_10 = arith.constant 0 : index
    %c0_11 = arith.constant 0 : index
    %27 = vector.load %arg5[%c0_10, %c0_11] : memref<128x128xf32, #tpu.memory_space<vmem>>, vector<128x128xf32>
    %cst_12 = arith.constant dense<0.000000e+00> : vector<8x128xf32>
    %28 = tpu.matmul %26, %27, %cst_12 {dimension_numbers = #tpu.dot_dimension_numbers<[1], [0], [0], [1], [0, 0, 1, 1], [], []>} : vector<8x128xf32>, vector<128x128xf32>, vector<8x128xf32> -> vector<8x128xf32>
    %c0_13 = arith.constant 0 : index
    %c0_14 = arith.constant 0 : index
    %29 = vector.load %arg6[%c0_13, %c0_14] : memref<1x128xf32, #tpu.memory_space<vmem>>, vector<1x128xf32>
    %30 = vector.broadcast %29 : vector<1x128xf32> to vector<8x128xf32>
    %31 = arith.addf %28, %30 : vector<8x128xf32>
    %c0_15 = arith.constant 0 : index
    %c0_16 = arith.constant 0 : index
    %32 = vector.load %arg7[%c0_15, %c0_16] : memref<8x128xf32, #tpu.memory_space<vmem>>, vector<8x128xf32>
    tpu.vector_store %arg7[%c0_15, %c0_16], %31 {strides = array<i32>} : memref<8x128xf32, #tpu.memory_space<vmem>>, vector<8x128xf32>,
    return
  }
  func.func @transform_0(%arg0: i32) -> (i32, i32) {
    %c0_i32 = arith.constant 0 : i32
    %c0_i32_0 = arith.constant 0 : i32
    return %arg0, %c0_i32 : i32, i32
  }
  func.func @transform_1(%arg0: i32) -> (i32, i32) {
    %c0_i32 = arith.constant 0 : i32
    %c0_i32_0 = arith.constant 0 : i32
    %c0_i32_1 = arith.constant 0 : i32
    return %c0_i32, %c0_i32_0 : i32, i32
  }
  func.func @transform_2(%arg0: i32) -> (i32, i32) {
    %c0_i32 = arith.constant 0 : i32
    %c0_i32_0 = arith.constant 0 : i32
    %c0_i32_1 = arith.constant 0 : i32
    return %c0_i32, %c0_i32_0 : i32, i32
  }
  func.func @transform_3(%arg0: i32) -> (i32, i32) {
    %c0_i32 = arith.constant 0 : i32
    %c0_i32_0 = arith.constant 0 : i32
    %c0_i32_1 = arith.constant 0 : i32
    return %c0_i32, %c0_i32_0 : i32, i32
  }
  func.func @transform_4(%arg0: i32) -> (i32, i32) {
    %c0_i32 = arith.constant 0 : i32
    %c0_i32_0 = arith.constant 0 : i32
    %c0_i32_1 = arith.constant 0 : i32
    return %c0_i32, %c0_i32_0 : i32, i32
  }
  func.func @transform_5(%arg0: i32) -> (i32, i32) {
    %c0_i32 = arith.constant 0 : i32
    %c0_i32_0 = arith.constant 0 : i32
    %c0_i32_1 = arith.constant 0 : i32
    return %c0_i32, %c0_i32_0 : i32, i32
  }
  func.func @transform_6(%arg0: i32) -> (i32, i32) {
    %c0_i32 = arith.constant 0 : i32
    %c0_i32_0 = arith.constant 0 : i32
    return %arg0, %c0_i32 : i32, i32
  }
}

</mosaic_0001>

<bundles_post_ra>
// kernel: gru_network_forward.1
= control target key start
LH: loop header
LB: loop body
LE: loop exit
PB: predicated region body
PF: predicated region fallthrough
CT: control target
= control target key end

     0   :  { %11 = vsyncpa [#allocation3], 0  ;;  %s545_s0 = inlined_call_operand.hbm [shape: f32[8,64], index: 0, kind: input, shape index: {}]   ;;  %s546_s1 = inlined_call_operand.hbm [shape: f32[64,384], index: 1, kind: input, shape index: {}]   ;;  %s547_s2 = inlined_call_operand.hbm [shape: f32[1,384], index: 2, kind: input, shape index: {}]   ;;  %s548_s3 = inlined_call_operand.vmem [shape: f32[1,128], index: 3, kind: input, shape index: {}]   ;;  %s549_s4 = inlined_call_operand.hbm [shape: f32[128,128], index: 4, kind: input, shape index: {}]   ;;  %s550_s5 = inlined_call_operand.hbm [shape: f32[1,128], index: 5, kind: input, shape index: {}]   ;;  %s551_s6 = inlined_call_operand.hbm [shape: f32[8,128], index: 6, kind: output, shape index: {}]  }
   0x1   :  { %12 = vsyncpa [#allocation6], 0 }
   0x2   :  { %13 = vsyncpa [#allocation9], 0  ;;  %s30_s23 = sshll.u32 %s546_s1, 4  ;;  %s31_s23 = int_to_ptr.hbm [resolvable:$true] %s30_s23 }
   0x3   :  { %14 = vsyncpa [#allocation4], 0  ;;  %s479_s24 = smov [#allocation5]   ;;  %s56_s28 = sshll.u32 %s549_s4, 4  ;;  %s57_s28 = int_to_ptr.hbm [resolvable:$true] %s56_s28 }
   0x4   :  { %s32_s25 = sshll.u32 %s479_s24, 4  ;;  %s480_s29 = smov 384   ;;  %s33_s25 = int_to_ptr.vmem [resolvable:$true] %s32_s25 }
   0x5   :  { %s481_s30 = smov 24   ;;  %s482_s7 = smov [#allocation8]  }
   0x6   :  { %38 = dma.hbm_to_vmem [thread:$0]  %s31_s23, 3072, %s33_s25, [#allocation6], %s480_s29, %s480_s29, %s481_s30  }
   0x7   :  { %s58_s8 = sshll.u32 %s482_s7, 4  ;;  %s483_s9 = smov 128   ;;  %s59_s8 = int_to_ptr.vmem [resolvable:$true] %s58_s8 }
   0x8   :  { %s484_s10 = smov 8   ;;  %s20_s12 = sshll.u32 %s545_s0, 4  ;;  %s21_s12 = int_to_ptr.hbm [resolvable:$true] %s20_s12 }
   0x9   :  { %64 = dma.hbm_to_vmem [thread:$0]  %s57_s28, 2048, %s59_s8, [#allocation9], %s483_s9, %s483_s9, %s484_s10  }
   0xa   :  { %s485_s13 = smov [#allocation2]   ;;  %s44_s16 = sshll.u32 %s547_s2, 4  ;;  %s45_s16 = int_to_ptr.hbm [resolvable:$true] %s44_s16 }
   0xb   :  { %s22_s14 = sshll.u32 %s485_s13, 4  ;;  %s486_s17 = smov [#allocation7]   ;;  %s23_s14 = int_to_ptr.vmem [resolvable:$true] %s22_s14 }
   0xc   :  { %25 = dma.hbm_to_vmem [thread:$0]  %s21_s12, 128, %s23_s14, [#allocation3]  }
   0xd   :  { %s46_s18 = sshll.u32 %s486_s17, 4  ;;  %s70_s21 = sshll.u32 %s550_s5, 4  ;;  %s47_s18 = int_to_ptr.vmem [resolvable:$true] %s46_s18  ;;  %s71_s21 = int_to_ptr.hbm [resolvable:$true] %s70_s21 }
   0xe   :  { %49 = dma.hbm_to_vmem [thread:$0]  %s45_s16, 48, %s47_s18, [#allocation6]  }
   0xf   :  { %s487_s0 = smov [#allocation10]  }
  0x10   :  { %s72_s22 = sshll.u32 %s487_s0, 4  ;;  %s73_s22 = int_to_ptr.vmem [resolvable:$true] %s72_s22 }
  0x11   :  { %75 = dma.hbm_to_vmem [thread:$0]  %s71_s21, 16, %s73_s22, [#allocation9]  }
  0x12   :  { %471 = dma.done.wait [#allocation3], 128  }
  0x13   :  { %472 = vsyncadd [#allocation3], 4294967168 }
  0x14   :  { %473 = dma.done.wait [#allocation6], 3120  }
  0x15   :  { %474 = vsyncadd [#allocation6], 4294964176 }
  0x16   :  { %475 = dma.done.wait [#allocation9], 2064  }
  0x17   :  { %476 = vsyncadd [#allocation9], 4294965232  ;;  %v118_v0 = vld [vmem:[#allocation5 + $0xa8] sm:$0xff]  ;;  %v119_v1 = vld [vmem:[#allocation5 + $0xb0] sm:$0xff]  ;;  %vm129_vm0 = vcmask 523264   ;;  %s288_s26 = sshll.u32 %s551_s6, 4  ;;  %s289_s26 = int_to_ptr.hbm [resolvable:$true] %s288_s26 }
  0x18   :  { %v115_v2 = vld [vmem:[#allocation5 + $0x90] sm:$0xff]  ;;  %141 = vmatpush.msra.mxu0 %v118_v0  ;;  %161 = vmatpush.msra.mxu1 %v119_v1  ;;  %v116_v3 = vld [vmem:[#allocation5 + $0x98] sm:$0xff]  ;;  %v113_v5 = vld [vmem:[#allocation5 + $0x80] sm:$0xff] }
  0x19   :  { %v112_v4 = vld [vmem:[#allocation5 + $0x78] sm:$0xff]  ;;  %v109_v6 = vld [vmem:[#allocation5 + $0x60] sm:$0xff]  ;;  %v110_v7 = vld [vmem:[#allocation5 + $0x68] sm:$0xff] }
  0x1a   :  { %142 = vmatpush.msra.mxu0 %v115_v2  ;;  %162 = vmatpush.msra.mxu1 %v116_v3  ;;  %v120_v8 = vld [vmem:[#allocation5 + $0xb8] sm:$0xff]  ;;  %v106_v9 = vld [vmem:[#allocation5 + $0x48] sm:$0xff]  ;;  %v107_v10 = vld [vmem:[#allocation5 + $0x50] sm:$0xff] }
  0x1b   :  { %181 = vmatpush.msra.mxu2 %v120_v8  ;;  %v117_v11 = vld [vmem:[#allocation5 + $0xa0] sm:$0xff]  ;;  %v114_v12 = vld [vmem:[#allocation5 + $0x88] sm:$0xff]  ;;  %v103_v13 = vld [vmem:[#allocation5 + $0x30] sm:$0xff] }
  0x1c   :  { %143 = vmatpush.msra.mxu0 %v112_v4  ;;  %163 = vmatpush.msra.mxu1 %v113_v5  ;;  %v104_v14 = vld [vmem:[#allocation5 + $0x38] sm:$0xff]  ;;  %v111_v15 = vld [vmem:[#allocation5 + $0x70] sm:$0xff]  ;;  %v101_v17 = vld [vmem:[#allocation5 + $0x20] sm:$0xff] }
  0x1d   :  { %182 = vmatpush.msra.mxu2 %v117_v11  ;;  %v100_v16 = vld [vmem:[#allocation5 + $0x18] sm:$0xff]  ;;  %v97_v19 = vld [vmem:[#allocation5] sm:$0xff]  ;;  %v98_v20 = vld [vmem:[#allocation5 + $0x8] sm:$0xff] }
  0x1e   :  { %144 = vmatpush.msra.mxu0 %v109_v6  ;;  %164 = vmatpush.msra.mxu1 %v110_v7  ;;  %v108_v18 = vld [vmem:[#allocation5 + $0x58] sm:$0xff]  ;;  %v105_v22 = vld [vmem:[#allocation5 + $0x40] sm:$0xff]  ;;  %v102_v23 = vld [vmem:[#allocation5 + $0x28] sm:$0xff] }
  0x1f   :  { %183 = vmatpush.msra.mxu2 %v114_v12  ;;  %v96_v21 = vld [vmem:[#allocation2] sm:$0xff]  ;;  %v99_v24 = vld [vmem:[#allocation5 + $0x10] sm:$0xff]  ;;  %v252_v28 = vld [vmem:[#allocation8 + $0x60] sm:$0xff] }
  0x20   :  { %145 = vmatpush.msra.mxu0 %v106_v9  ;;  %165 = vmatpush.msra.mxu1 %v107_v10  ;;  %v255_v25 = vld [vmem:[#allocation8 + $0x78] sm:$0xff]  ;;  %v254_v26 = vld [vmem:[#allocation8 + $0x70] sm:$0xff]  ;;  %v253_v27 = vld [vmem:[#allocation8 + $0x68] sm:$0xff] }
  0x21   :  { %184 = vmatpush.msra.mxu2 %v111_v15  ;;  %260 = vmatpush.msra.mxu3 %v255_v25  ;;  %v251_v29 = vld [vmem:[#allocation8 + $0x58] sm:$0xff]  ;;  %v250_v30 = vld [vmem:[#allocation8 + $0x50] sm:$0xff]  ;;  %v249_v31 = vld [vmem:[#allocation8 + $0x48] sm:$0xff] }
  0x22   :  { %146 = vmatpush.msra.mxu0 %v103_v13  ;;  %166 = vmatpush.msra.mxu1 %v104_v14  ;;  %v248_v32 = vld [vmem:[#allocation8 + $0x40] sm:$0xff]  ;;  %v121_v33 = vld [vmem:[#allocation7] sm:$0x7]  ;;  %v246_v37 = vld [vmem:[#allocation8 + $0x30] sm:$0xff] }
  0x23   :  { %185 = vmatpush.msra.mxu2 %v108_v18  ;;  %261 = vmatpush.msra.mxu3 %v254_v26  ;;  %v247_v34 = vld [vmem:[#allocation8 + $0x38] sm:$0xff]  ;;  %v123_v35 = vperm.slane %v121_v33, 0  ;;  %v124_v36 = vperm.slane %v121_v33, 1  ;;  %v245_v42 = vld [vmem:[#allocation8 + $0x28] sm:$0xff]  ;;  %v244_v45 = vld [vmem:[#allocation8 + $0x20] sm:$0xff]  ;;  %v125_v61 = vperm.slane %v121_v33, 2 }
  0x24   :  { %147 = vmatpush.msra.mxu0 %v100_v16  ;;  %167 = vmatpush.msra.mxu1 %v101_v17  ;;  %v243_v46 = vld [vmem:[#allocation8 + $0x18] sm:$0xff]  ;;  %v242_v47 = vld [vmem:[#allocation8 + $0x10] sm:$0xff]  ;;  %v241_v48 = vld [vmem:[#allocation8 + $0x8] sm:$0xff] }
  0x25   :  { %186 = vmatpush.msra.mxu2 %v105_v22  ;;  %262 = vmatpush.msra.mxu3 %v253_v27  ;;  %v240_v49 = vld [vmem:[#allocation8] sm:$0xff]  ;;  %v315_v3 = vld [vmem:[%s548_s3] ss:$0 sm:$0xff]  ;;  %s488_s3 = smov [#allocation11]  }
  0x26   :  { %148 = vmatpush.msra.mxu0 %v97_v19  ;;  %168 = vmatpush.msra.mxu1 %v98_v20  ;;  %v316_v19 = vld [vmem:[#allocation10] ss:$0 sm:$0xff]  ;;  %s286_s23 = sshll.u32 %s488_s3, 4  ;;  %s287_s23 = int_to_ptr.vmem [resolvable:$true] %s286_s23 }
  0x27   :  { %300 = vmatmul.msk.f32.vlgmr.msra.gmra.mxu0 %vm129_vm0, %v96_v21  ;;  %301 = vmatmul.msk.f32.vlgmr.msra.gmra.mxu1 %vm129_vm0, %v96_v21 }
  0x28   :  { %187 = vmatpush.msra.mxu2 %v102_v23  ;;  %263 = vmatpush.msra.mxu3 %v252_v28 }
  0x2a   :  { %188 = vmatpush.msra.mxu2 %v99_v24  ;;  %264 = vmatpush.msra.mxu3 %v251_v29 }
  0x2b   :  { %302 = vmatmul.msk.f32.vlgmr.msra.gmra.mxu2 %vm129_vm0, %v96_v21 }
  0x2c   :  { %265 = vmatpush.msra.mxu3 %v250_v30 }
  0x2e   :  { %266 = vmatpush.msra.mxu3 %v249_v31 }
  0x30   :  { %267 = vmatpush.msra.mxu3 %v248_v32 }
  0x32   :  { %268 = vmatpush.msra.mxu3 %v247_v34 }
  0x34   :  { %269 = vmatpush.msra.mxu3 %v246_v37 }
  0x36   :  { %270 = vmatpush.msra.mxu3 %v245_v42 }
  0x38   :  { %271 = vmatpush.msra.mxu3 %v244_v45 }
  0x3a   :  { %272 = vmatpush.msra.mxu3 %v243_v46 }
  0x3c   :  { %273 = vmatpush.msra.mxu3 %v242_v47 }
  0x3e   :  { %274 = vmatpush.msra.mxu3 %v241_v48 }
  0x40   :  { %275 = vmatpush.msra.mxu3 %v240_v49 }
  0xa4   :  { %v150_v38 = vpop.f32.mrf.mxu0  ;;  %v170_v39 = vpop.f32.mrf.mxu1 }
  0xa5   :  { %v151_v40 = vadd.f32 %v150_v38, %v123_v35  ;;  %v171_v41 = vadd.f32 %v170_v39, %v124_v36 }
  0xa7   :  { %v303_v43 = vmul.f32 -1.442695, %v151_v40  ;;  %v304_v44 = vmul.f32 -1.442695, %v171_v41 }
  0xa9   :  { %317 = vpow2.f32 %v303_v43 }
  0xaa   :  { %319 = vpow2.f32 %v304_v44 }
  0xae   :  { %v190_v0 = vpop.f32.mrf.mxu2 }
  0xaf   :  { %v318_v50 = vpop.eup %317  ;;  %v191_v5 = vadd.f32 %v190_v0, %v125_v61 }
  0xb0   :  { %v320_v51 = vpop.eup %319  ;;  %v196_v52 = vadd.f32 1.0, %v318_v50 }
  0xb1   :  { %v215_v53 = vadd.f32 1.0, %v320_v51 }
  0xb2   :  { %321 = vrcp.f32 %v196_v52  ;;  %v208_v59 = vand.u32 2147483648, %v196_v52  ;;  %v206_v63 = vand.u32 2147483647, %v196_v52  ;;  %vm202_vm2 = vweird.f32 %v196_v52 }
  0xb3   :  { %323 = vrcp.f32 %v215_v53  ;;  %vm221_vm5 = vweird.f32 %v215_v53  ;;  %v227_v10 = vand.u32 2147483648, %v215_v53  ;;  %v225_v11 = vand.u32 2147483647, %v215_v53 }
  0xb4   :  { %v209_v4 = vor.u32 1.1754944e-38, %v208_v59  ;;  %vm207_vm4 = vcmp.eq.f32.partialorder %v206_v63, 8.507059e+37 }
  0xb5   :  { %v228_v14 = vor.u32 1.1754944e-38, %v227_v10  ;;  %vm226_vm8 = vcmp.eq.f32.partialorder %v225_v11, 8.507059e+37 }
  0xb8   :  { %v322_v54 = vpop.eup %321 }
  0xb9   :  { %v324_v55 = vpop.eup %323  ;;  %v198_v56 = vmul.f32 %v322_v54, %v196_v52  ;;  %vm203_vm1 = vweird.f32 %v322_v54 }
  0xba   :  { %v217_v57 = vmul.f32 %v324_v55, %v215_v53  ;;  %vm204_vm3 = vmor %vm202_vm2, %vm203_vm1  ;;  %vm222_vm6 = vweird.f32 %v324_v55 }
  0xbb   :  { %v199_v58 = vsub.f32 1.0, %v198_v56  ;;  %vm223_vm7 = vmor %vm221_vm5, %vm222_vm6 }
  0xbc   :  { %v218_v60 = vsub.f32 1.0, %v217_v57 }
  0xbd   :  { %v200_v62 = vmul.f32 %v322_v54, %v199_v58 }
  0xbe   :  { %v219_v1 = vmul.f32 %v324_v55, %v218_v60 }
  0xbf   :  { %v201_v2 = vadd.f32 %v322_v54, %v200_v62 }
  0xc0   :  { %v220_v8 = vadd.f32 %v324_v55, %v219_v1 }
  0xc1   :  { %v205_v6 = vsel %vm204_vm3, %v322_v54, %v201_v2 }
  0xc2   :  { %v210_v7 = vsel %vm207_vm4, %v209_v4, %v205_v6  ;;  %v224_v13 = vsel %vm223_vm7, %v324_v55, %v220_v8 }
  0xc3   :  { %v235_v9 = vmul.f32 %v315_v3, %v210_v7  ;;  %v229_v15 = vsel %vm226_vm8, %v228_v14, %v224_v13 }
  0xc4   :  { %v238_v16 = vsub.f32 1.0, %v229_v15 }
  0xc5   :  { %v236_v12 = vadd.f32 %v235_v9, %v191_v5 }
  0xc7   :  { %325 = vtanh.f32 %v236_v12 }
  0xcd   :  { %v326_v17 = vpop.eup %325 }
  0xce   :  { %v239_v18 = vmul.f32 %v326_v17, %v238_v16 }
  0xd0   :  { %276 = vmatmul.f32.vlgmr.msra.gmra.mxu3 %v239_v18 }
 0x153   :  { %v277_v20 = vpop.f32.mrf.mxu3 }
 0x154   :  { %v278_v21 = vadd.f32 %v316_v19, %v277_v20 }
 0x156   :  { %280 = vst [vmem:[#allocation11] sm:$0xff] %v278_v21 }
 0x157   :  { %291 = dma.vmem_to_hbm [thread:$0]  %s287_s23, 128, %s289_s26, [#allocation4]  }
 0x158   :  { %477 = dma.done.wait [#allocation4], 128  }
 0x159   :  { %478 = vsyncadd [#allocation4], 4294967168 }
 0x15a   :  { %296 = vsyncpa [#allocation3], 1 }
 0x15b   :  { %297 = vsyncpa [#allocation6], 1 }
 0x15c   :  { %298 = vsyncpa [#allocation9], 1 }
 0x15d   :  { %299 = vsyncpa [#allocation4], 1 }

</bundles_post_ra>
